<compile_context>
chip_gen: v7x
topology: tpu7x:2x2x1
jax: 0.10.0
libtpu: 0.0.40
codegen_flags: <defaults>
</compile_context>

<pallas_src>
import functools
import inspect

import jax
import jax.numpy as jnp
from jax.experimental import pallas as pl
from jax.experimental.pallas import tpu as pltpu

LANE = 128          # feature dims padded to a multiple of this (lane-dense tiles)
SUBLANE_BF16 = 16   # batch padded to a multiple of this (bf16 sublane packing)

# Does this JAX expose per-BlockSpec pipeline_mode (for single-buffered resident weights)?
try:
    _HAS_PIPELINE_MODE = (
        hasattr(pl, "Buffered")
        and "pipeline_mode" in inspect.signature(pl.BlockSpec).parameters
    )
except (TypeError, ValueError):
    _HAS_PIPELINE_MODE = False


def _round_up(x, m):
    return (x + m - 1) // m * m


def _vmem_budget():
    """Usable VMEM budget (bytes) with headroom; conservative fallback if query fails."""
    try:
        phys = int(pltpu.get_tpu_info().vmem_capacity_bytes)
    except Exception:
        phys = 64 * 1024 * 1024   # v7x per-TensorCore physical VMEM (smallest of the fleet)
    return int(phys * 0.9)


def _vmem_estimate(tb, pdims, out_itemsize, weight_bufs):
    """Rough VMEM footprint of one fused call (bytes)."""
    n_layers = len(pdims) - 1
    w_bytes = sum(pdims[i] * pdims[i + 1] * 2 + pdims[i + 1] * 4 for i in range(n_layers))
    io_bytes = 2 * tb * pdims[0] * 2 + 2 * tb * pdims[-1] * out_itemsize  # dbl-buffered x/out tiles
    act_bytes = sum(tb * d * 4 for d in pdims[1:])                        # f32 accumulators
    return weight_bufs * w_bytes + io_bytes + act_bytes + (2 << 20)       # +2 MiB headroom


def _choose_tb(B, block_b):
    """Batch tile: multiple of 16, <= block_b; split into >=2 tiles for small B (v7x megacore)."""
    block_b = max(SUBLANE_BF16, _round_up(block_b, SUBLANE_BF16))
    b16 = _round_up(max(B, 1), SUBLANE_BF16)
    if b16 > block_b:
        return block_b
    if b16 <= SUBLANE_BF16:
        return SUBLANE_BF16
    # B fits in one block: split so both v7x TensorCores get a tile (no cost on v5e/v6e).
    return _round_up((b16 + 1) // 2, SUBLANE_BF16)


def _resident_spec(shape):
    """BlockSpec for a VMEM-resident operand (constant block index across the batch grid)."""
    index_map = lambda i: (0,) * len(shape)
    if _HAS_PIPELINE_MODE:
        # Constant-index operand: double-buffering is pure VMEM waste -> single buffer.
        return pl.BlockSpec(shape, index_map, pipeline_mode=pl.Buffered(1))
    return pl.BlockSpec(shape, index_map)


def _ffnn_kernel(*refs, relu_flags):
    """Fused MLP on one batch tile.

    refs layout: (x_ref, w0, b0, ..., w_{L-1}, b_{L-1}, o_ref)
      x_ref : (tb, D0)        bf16
      w_i   : (D_i, D_{i+1})  bf16   (VMEM-resident)
      b_i   : (1,   D_{i+1})  f32
      o_ref : (tb, D_L)       out dtype
    """
    num_layers = len(relu_flags)
    x_ref = refs[0]
    o_ref = refs[1 + 2 * num_layers]

    h = x_ref[...]                                    # bf16 activation, stays on-chip
    acc = None
    for i in range(num_layers):
        w_ref = refs[1 + 2 * i]
        b_ref = refs[2 + 2 * i]
        acc = jnp.dot(h, w_ref[...], preferred_element_type=jnp.float32)   # MXU, f32 acc
        acc = acc + b_ref[...]                        # f32 bias broadcast over batch
        if relu_flags[i]:
            acc = jnp.maximum(acc, 0.0)               # ReLU on f32 (v5e-safe)
        if i < num_layers - 1:
            h = acc.astype(jnp.bfloat16)              # back to bf16 for the next MXU pass
    o_ref[...] = acc.astype(o_ref.dtype)


def _mlp_call(xp, layers, relu_flags, out_dtype, tb, vmem_limit):
    """One pallas_call running `layers` fused, streaming batch tiles of size tb."""
    b_pad, pd_in = xp.shape
    pd_out = layers[-1][0].shape[1]

    flat_inputs = [xp]
    in_specs = [pl.BlockSpec((tb, pd_in), lambda i: (i, 0))]
    for (wp, bp) in layers:
        flat_inputs += [wp, bp]
        in_specs += [_resident_spec(wp.shape), _resident_spec(bp.shape)]

    return pl.pallas_call(
        functools.partial(_ffnn_kernel, relu_flags=tuple(relu_flags)),
        out_shape=jax.ShapeDtypeStruct((b_pad, pd_out), out_dtype),
        grid=(b_pad // tb,),
        in_specs=in_specs,
        out_specs=pl.BlockSpec((tb, pd_out), lambda i: (i, 0)),
        compiler_params=pltpu.CompilerParams(
            dimension_semantics=("parallel",),     # batch tiles independent -> megacore split
            vmem_limit_bytes=int(vmem_limit),
        ),
    )(*flat_inputs)


def prepare_ffnn_params(params):
    """Pad feature dims to multiples of 128 and cast to MXU dtypes ONCE (hoisted out of forward).

    params: [(w0, b0), ..., (wL, bL)] with w: (d_in, d_out) f32, b: (d_out,) f32.
    Returns [(wp bf16 (pdi, pdo), bp f32 (1, pdo)), ...].
    """
    prepared = []
    for (w, b) in params:
        di, do = w.shape
        pdi, pdo = _round_up(di, LANE), _round_up(do, LANE)
        wp = w.astype(jnp.bfloat16)
        if (pdi - di) or (pdo - do):
            wp = jnp.pad(wp, ((0, pdi - di), (0, pdo - do)))
        bp = b.astype(jnp.float32)
        if pdo - do:
            bp = jnp.pad(bp, (0, pdo - do))
        prepared.append((wp, bp.reshape(1, pdo)))
    return prepared


def ffnn_forward(x, prepared_params, out_dim=None, *, block_b=256, out_dtype=jnp.float32):
    """y = FFNN(x). prepared_params = prepare_ffnn_params(params); out_dim = true output width."""
    B, d_in = x.shape
    num_layers = len(prepared_params)
    pdims = [prepared_params[0][0].shape[0]] + [w.shape[1] for (w, _) in prepared_params]
    if out_dim is None:
        out_dim = pdims[-1]
    assert d_in <= pdims[0], "input feature dim larger than prepared layer-0 weight"

    tb = _choose_tb(B, block_b)
    b_pad = _round_up(B, tb)

    # Pad + cast the input; skipped entirely when already aligned.
    xb = x.astype(jnp.bfloat16)
    if (b_pad - B) or (pdims[0] - d_in):
        xb = jnp.pad(xb, ((0, b_pad - B), (0, pdims[0] - d_in)))

    relu_flags = [True] * (num_layers - 1) + [False]
    budget = _vmem_budget()
    out_itemsize = jnp.dtype(out_dtype).itemsize
    weight_bufs = 1 if _HAS_PIPELINE_MODE else 2

    if _vmem_estimate(tb, pdims, out_itemsize, weight_bufs) <= budget:
        # Fully fused: all weights VMEM-resident, activation never leaves the chip.
        out_pad = _mlp_call(xb, prepared_params, relu_flags, out_dtype, tb, budget)
    else:
        # Weights don't fit VMEM together (e.g. big MLP on v7x's 64 MiB): run layer by
        # layer; intermediate activations round-trip HBM in bf16 (half writeback).
        # TODO(synk): column-tile a single layer whose weight alone exceeds the budget.
        h = xb
        for i, (wp, bp) in enumerate(prepared_params):
            layer_dtype = out_dtype if i == num_layers - 1 else jnp.bfloat16
            h = _mlp_call(h, [(wp, bp)], [relu_flags[i]], layer_dtype, tb, budget)
        out_pad = h

    if b_pad != B or pdims[-1] != out_dim:
        return out_pad[:B, :out_dim]
    return out_pad


def init_ffnn_params(key, input_dim, hidden_dim, out_dim, num_hidden):
    """Parameters matching the PyTorch module: num_hidden (Linear+ReLU) blocks + final Linear."""
    dim_list = [input_dim] + [hidden_dim] * num_hidden + [out_dim]
    params = []
    for d_in, d_out in zip(dim_list[:-1], dim_list[1:]):
        key, kw, kb = jax.random.split(key, 3)
        bound = 1.0 / jnp.sqrt(jnp.float32(d_in))
        w = jax.random.uniform(kw, (d_in, d_out), jnp.float32, -bound, bound)
        b = jax.random.uniform(kb, (d_out,), jnp.float32, -bound, bound)
        params.append((w, b))
    return params


if __name__ == "__main__":
    # Small shapes consistent with the module's forward: x is (batch, input_dim).
    batch, input_dim, hidden_dim, out_dim, num_hidden = 8, 32, 32, 16, 2

    key = jax.random.PRNGKey(0)
    key, kx = jax.random.split(key)
    x = jax.random.normal(kx, (batch, input_dim), jnp.float32)

    params = init_ffnn_params(key, input_dim, hidden_dim, out_dim, num_hidden)

    # Padding / bf16 cast of weights done ONCE here, not per forward call.
    prepared = prepare_ffnn_params(params)

    fwd = jax.jit(functools.partial(ffnn_forward, out_dim=out_dim))
    out = fwd(x, prepared)
    jax.block_until_ready(out)
    assert out.shape == (batch, out_dim)

    # Reference mirroring the kernel numerics (bf16 MXU inputs, f32 accumulate) -> tight check.
    h = x.astype(jnp.bfloat16)
    acc = None
    for i, (w, b) in enumerate(params):
        acc = jnp.dot(h, w.astype(jnp.bfloat16),
                      preferred_element_type=jnp.float32) + b.astype(jnp.float32)
        if i != len(params) - 1:
            acc = jnp.maximum(acc, 0.0)
            h = acc.astype(jnp.bfloat16)
    assert jnp.allclose(out, acc, atol=1e-3, rtol=1e-3)

    # Pure-f32 reference (original PyTorch semantics) -> loose check for bf16 rounding.
    ref = x
    for i, (w, b) in enumerate(params):
        ref = ref @ w + b
        if i != len(params) - 1:
            ref = jnp.maximum(ref, 0.0)
    assert jnp.allclose(out, ref, atol=5e-2, rtol=5e-2)

    print("KERNEL_OK")
</pallas_src>

<mosaic_0001>
module attributes {stable_mosaic.version = 11 : i64} {
  func.func @_ffnn_kernel(%arg0: i32, %arg1: memref<16x128xbf16, #tpu.memory_space<vmem>>, %arg2: memref<128x128xbf16, #tpu.memory_space<vmem>>, %arg3: memref<1x128xf32, #tpu.memory_space<vmem>>, %arg4: memref<128x128xbf16, #tpu.memory_space<vmem>>, %arg5: memref<1x128xf32, #tpu.memory_space<vmem>>, %arg6: memref<128x128xbf16, #tpu.memory_space<vmem>>, %arg7: memref<1x128xf32, #tpu.memory_space<vmem>>, %arg8: memref<16x128xf32, #tpu.memory_space<vmem>>) attributes {dimension_semantics = [#tpu.dimension_semantics<parallel>], iteration_bounds = array<i64: 1>, scalar_prefetch = 0 : i64, scratch_operands = 0 : i64, tpu.core_type = #tpu.core_type<tc>, window_params = [{transform_indices = @transform_0, window_bounds = array<i64: 16, 128>}, {pipeline_mode = #tpu.pipeline_mode<synchronous>, transform_indices = @transform_1, window_bounds = array<i64: 128, 128>}, {pipeline_mode = #tpu.pipeline_mode<synchronous>, transform_indices = @transform_2, window_bounds = array<i64: 1, 128>}, {pipeline_mode = #tpu.pipeline_mode<synchronous>, transform_indices = @transform_3, window_bounds = array<i64: 128, 128>}, {pipeline_mode = #tpu.pipeline_mode<synchronous>, transform_indices = @transform_4, window_bounds = array<i64: 1, 128>}, {pipeline_mode = #tpu.pipeline_mode<synchronous>, transform_indices = @transform_5, window_bounds = array<i64: 128, 128>}, {pipeline_mode = #tpu.pipeline_mode<synchronous>, transform_indices = @transform_6, window_bounds = array<i64: 1, 128>}, {transform_indices = @transform_7, window_bounds = array<i64: 16, 128>}]} {
    %c0 = arith.constant 0 : index
    %c0_0 = arith.constant 0 : index
    %0 = vector.load %arg1[%c0, %c0_0] : memref<16x128xbf16, #tpu.memory_space<vmem>>, vector<16x128xbf16>
    %c0_1 = arith.constant 0 : index
    %c0_2 = arith.constant 0 : index
    %1 = vector.load %arg2[%c0_1, %c0_2] : memref<128x128xbf16, #tpu.memory_space<vmem>>, vector<128x128xbf16>
    %cst = arith.constant dense<0.000000e+00> : vector<16x128xf32>
    %2 = tpu.matmul %0, %1, %cst {dimension_numbers = #tpu.dot_dimension_numbers<[1], [0], [0], [1], [0, 0, 1, 1], [], []>} : vector<16x128xbf16>, vector<128x128xbf16>, vector<16x128xf32> -> vector<16x128xf32>
    %c0_3 = arith.constant 0 : index
    %c0_4 = arith.constant 0 : index
    %3 = vector.load %arg3[%c0_3, %c0_4] : memref<1x128xf32, #tpu.memory_space<vmem>>, vector<1x128xf32>
    %4 = vector.broadcast %3 : vector<1x128xf32> to vector<16x128xf32>
    %5 = arith.addf %2, %4 : vector<16x128xf32>
    %cst_5 = arith.constant 0.000000e+00 : f32
    %6 = vector.broadcast %cst_5 : f32 to vector<16x128xf32>
    %7 = arith.maximumf %5, %6 : vector<16x128xf32>
    %8 = arith.truncf %7 : vector<16x128xf32> to vector<16x128xbf16>
    %c0_6 = arith.constant 0 : index
    %c0_7 = arith.constant 0 : index
    %9 = vector.load %arg4[%c0_6, %c0_7] : memref<128x128xbf16, #tpu.memory_space<vmem>>, vector<128x128xbf16>
    %cst_8 = arith.constant dense<0.000000e+00> : vector<16x128xf32>
    %10 = tpu.matmul %8, %9, %cst_8 {dimension_numbers = #tpu.dot_dimension_numbers<[1], [0], [0], [1], [0, 0, 1, 1], [], []>} : vector<16x128xbf16>, vector<128x128xbf16>, vector<16x128xf32> -> vector<16x128xf32>
    %c0_9 = arith.constant 0 : index
    %c0_10 = arith.constant 0 : index
    %11 = vector.load %arg5[%c0_9, %c0_10] : memref<1x128xf32, #tpu.memory_space<vmem>>, vector<1x128xf32>
    %12 = vector.broadcast %11 : vector<1x128xf32> to vector<16x128xf32>
    %13 = arith.addf %10, %12 : vector<16x128xf32>
    %cst_11 = arith.constant 0.000000e+00 : f32
    %14 = vector.broadcast %cst_11 : f32 to vector<16x128xf32>
    %15 = arith.maximumf %13, %14 : vector<16x128xf32>
    %16 = arith.truncf %15 : vector<16x128xf32> to vector<16x128xbf16>
    %c0_12 = arith.constant 0 : index
    %c0_13 = arith.constant 0 : index
    %17 = vector.load %arg6[%c0_12, %c0_13] : memref<128x128xbf16, #tpu.memory_space<vmem>>, vector<128x128xbf16>
    %cst_14 = arith.constant dense<0.000000e+00> : vector<16x128xf32>
    %18 = tpu.matmul %16, %17, %cst_14 {dimension_numbers = #tpu.dot_dimension_numbers<[1], [0], [0], [1], [0, 0, 1, 1], [], []>} : vector<16x128xbf16>, vector<128x128xbf16>, vector<16x128xf32> -> vector<16x128xf32>
    %c0_15 = arith.constant 0 : index
    %c0_16 = arith.constant 0 : index
    %19 = vector.load %arg7[%c0_15, %c0_16] : memref<1x128xf32, #tpu.memory_space<vmem>>, vector<1x128xf32>
    %20 = vector.broadcast %19 : vector<1x128xf32> to vector<16x128xf32>
    %21 = arith.addf %18, %20 : vector<16x128xf32>
    %c0_17 = arith.constant 0 : index
    %c0_18 = arith.constant 0 : index
    %22 = vector.load %arg8[%c0_17, %c0_18] : memref<16x128xf32, #tpu.memory_space<vmem>>, vector<16x128xf32>
    tpu.vector_store %arg8[%c0_17, %c0_18], %21 {strides = array<i32>} : memref<16x128xf32, #tpu.memory_space<vmem>>, vector<16x128xf32>,
    return
  }
  func.func @transform_0(%arg0: i32) -> (i32, i32) {
    %c0_i32 = arith.constant 0 : i32
    %c0_i32_0 = arith.constant 0 : i32
    return %arg0, %c0_i32 : i32, i32
  }
  func.func @transform_1(%arg0: i32) -> (i32, i32) {
    %c0_i32 = arith.constant 0 : i32
    %c0_i32_0 = arith.constant 0 : i32
    %c0_i32_1 = arith.constant 0 : i32
    return %c0_i32, %c0_i32_0 : i32, i32
  }
  func.func @transform_2(%arg0: i32) -> (i32, i32) {
    %c0_i32 = arith.constant 0 : i32
    %c0_i32_0 = arith.constant 0 : i32
    %c0_i32_1 = arith.constant 0 : i32
    return %c0_i32, %c0_i32_0 : i32, i32
  }
  func.func @transform_3(%arg0: i32) -> (i32, i32) {
    %c0_i32 = arith.constant 0 : i32
    %c0_i32_0 = arith.constant 0 : i32
    %c0_i32_1 = arith.constant 0 : i32
    return %c0_i32, %c0_i32_0 : i32, i32
  }
  func.func @transform_4(%arg0: i32) -> (i32, i32) {
    %c0_i32 = arith.constant 0 : i32
    %c0_i32_0 = arith.constant 0 : i32
    %c0_i32_1 = arith.constant 0 : i32
    return %c0_i32, %c0_i32_0 : i32, i32
  }
  func.func @transform_5(%arg0: i32) -> (i32, i32) {
    %c0_i32 = arith.constant 0 : i32
    %c0_i32_0 = arith.constant 0 : i32
    %c0_i32_1 = arith.constant 0 : i32
    return %c0_i32, %c0_i32_0 : i32, i32
  }
  func.func @transform_6(%arg0: i32) -> (i32, i32) {
    %c0_i32 = arith.constant 0 : i32
    %c0_i32_0 = arith.constant 0 : i32
    %c0_i32_1 = arith.constant 0 : i32
    return %c0_i32, %c0_i32_0 : i32, i32
  }
  func.func @transform_7(%arg0: i32) -> (i32, i32) {
    %c0_i32 = arith.constant 0 : i32
    %c0_i32_0 = arith.constant 0 : i32
    return %arg0, %c0_i32 : i32, i32
  }
}

</mosaic_0001>

<bundles_post_ra>
// kernel: ffnn_forward.1
= control target key start
LH: loop header
LB: loop body
LE: loop exit
PB: predicated region body
PF: predicated region fallthrough
CT: control target
= control target key end

     0   :  { %12 = vsyncpa [#allocation3], 0  ;;  %s790_s0 = inlined_call_operand.vmem [shape: bf16[16,128], index: 0, kind: input, shape index: {}]   ;;  %s791_s1 = inlined_call_operand.hbm [shape: bf16[128,128], index: 1, kind: input, shape index: {}]   ;;  %s792_s2 = inlined_call_operand.vmem [shape: f32[1,128], index: 2, kind: input, shape index: {}]   ;;  %s793_s3 = inlined_call_operand.hbm [shape: bf16[128,128], index: 3, kind: input, shape index: {}]   ;;  %s794_s4 = inlined_call_operand.vmem [shape: f32[1,128], index: 4, kind: input, shape index: {}]   ;;  %s795_s5 = inlined_call_operand.hbm [shape: bf16[128,128], index: 5, kind: input, shape index: {}]   ;;  %s796_s6 = inlined_call_operand.vmem [shape: f32[1,128], index: 6, kind: input, shape index: {}]   ;;  %s797_s7 = inlined_call_operand.vmem [shape: f32[16,128], index: 7, kind: output, shape index: {}]  }
   0x1   :  { %13 = vsyncpa [#allocation5], 0  ;;  %s643_s24 = smov [#allocation4]   ;;  %s644_s26 = smov [#allocation2]  }
   0x2   :  { %s35_s25 = sshll.u32 %s643_s24, 4  ;;  %s21_s27 = sshll.u32 %s644_s26, 4  ;;  %s36_s25 = int_to_ptr.vmem [resolvable:$true] %s35_s25  ;;  %s690_s27 = int_to_ptr.vmem [resolvable:$true] %s21_s27 }
   0x3   :  { %s573_s30 = scalar_lea.hbm %s793_s3, 1024 }
   0x4   :  { %p574_p0 = scmp.ne.s32.totalorder %s793_s3, %s573_s30  ;;  %p577_p1 = scmp.lt.u32.totalorder %s573_s30, %s793_s3 }
   0x6   :  { %p579_p2 = pnand %p577_p1, %p574_p0 }
   0x8   :  { %582 = shalt.err (!%p579_p2)
}
   0x9   :  { %s583_s12 = scalar_lea.vmem %s36_s25, 1024  ;;  %p588_p4 = scmp.lt.s32.totalorder %s36_s25, %s36_s25 }
   0xa   :  { %p584_p3 = scmp.ne.s32.totalorder %s36_s25, %s583_s12  ;;  %p589_p5 = scmp.lt.s32.totalorder %s583_s12, %s583_s12 }
   0xc   :  { %p590_p6 = por %p589_p5, %p588_p4 }
   0xe   :  { %p591_p7 = pnand %p590_p6, %p584_p3 }
  0x10   :  { %594 = shalt.err (!%p591_p7)
}
  0x11   :  { %s645_s13 = smov 64   ;;  %s646_s14 = smov 4  }
  0x12   :  { %41 = dma.hbm_to_vmem [thread:$0]  %s793_s3, 1024, %s36_s25, [#allocation5], %s645_s13, %s645_s13, %s646_s14  }
  0x13   :  { %s595_s19 = scalar_lea.hbm %s791_s1, 1024 }
  0x14   :  { %p596_p8 = scmp.ne.s32.totalorder %s791_s1, %s595_s19  ;;  %p599_p9 = scmp.lt.u32.totalorder %s595_s19, %s791_s1 }
  0x16   :  { %p601_p10 = pnand %p599_p9, %p596_p8 }
  0x18   :  { %604 = shalt.err (!%p601_p10)
}
  0x19   :  { %s605_s24 = scalar_lea.vmem %s690_s27, 1024  ;;  %p610_p12 = scmp.lt.s32.totalorder %s690_s27, %s690_s27 }
  0x1a   :  { %p606_p11 = scmp.ne.s32.totalorder %s690_s27, %s605_s24  ;;  %p611_p13 = scmp.lt.s32.totalorder %s605_s24, %s605_s24 }
  0x1c   :  { %p612_p0 = por %p611_p13, %p610_p12 }
  0x1e   :  { %p613_p1 = pnand %p612_p0, %p606_p11 }
  0x20   :  { %616 = shalt.err (!%p613_p1)
}
  0x21   :  { %27 = dma.hbm_to_vmem [thread:$0]  %s791_s1, 1024, %s690_s27, [#allocation3], %s645_s13, %s645_s13, %s646_s14  }
  0x22   :  { %s647_s26 = smov [#allocation6]   ;;  %s617_s8 = scalar_lea.hbm %s795_s5, 1024 }
  0x23   :  { %s49_s28 = sshll.u32 %s647_s26, 4  ;;  %p618_p2 = scmp.ne.s32.totalorder %s795_s5, %s617_s8  ;;  %s50_s28 = int_to_ptr.vmem [resolvable:$true] %s49_s28 }
  0x24   :  { %p621_p3 = scmp.lt.u32.totalorder %s617_s8, %s795_s5 }
  0x26   :  { %p623_p4 = pnand %p621_p3, %p618_p2 }
  0x28   :  { %626 = shalt.err (!%p623_p4)
}
  0x29   :  { %s627_s15 = scalar_lea.vmem %s50_s28, 1024  ;;  %p632_p6 = scmp.lt.s32.totalorder %s50_s28, %s50_s28 }
  0x2a   :  { %p628_p5 = scmp.ne.s32.totalorder %s50_s28, %s627_s15  ;;  %p633_p7 = scmp.lt.s32.totalorder %s627_s15, %s627_s15 }
  0x2c   :  { %p634_p8 = por %p633_p7, %p632_p6 }
  0x2e   :  { %p635_p9 = pnand %p634_p8, %p628_p5 }
  0x30   :  { %638 = shalt.err (!%p635_p9)
}
  0x31   :  { %55 = dma.hbm_to_vmem [thread:$0]  %s795_s5, 1024, %s50_s28, [#allocation5], %s645_s13, %s645_s13, %s646_s14  }
  0x32   :  { %639 = dma.done.wait [#allocation3], 1024  }
  0x33   :  { %640 = vsyncadd [#allocation3], 4294966272 }
  0x34   :  { %641 = dma.done.wait [#allocation5], 2048  }
  0x35   :  { %642 = vsyncadd [#allocation5], 4294965248  ;;  %v648_v0 = vmov 0.0   ;;  %vm649_vm0 = vmmov 0   ;;  %v548_v1 = vld [vmem:[#allocation2] sm:$0xff]   ;;  %v549_v2 = vld [vmem:[#allocation2 + $0x8] sm:$0xff]  }
  0x36   :  { %481 = vmatprep.subr.bf16.mxu0 %v648_v0  ;;  %497 = vmatprep.mubr.msk.bf16.mxu0 %vm649_vm0, %v648_v0  ;;  %v550_v3 = vld [vmem:[#allocation2 + $0x10] sm:$0xff]   ;;  %v557_v4 = vld [vmem:[#allocation4] sm:$0xff]   ;;  %v551_v5 = vld [vmem:[#allocation2 + $0x18] sm:$0xff]  }
  0x37   :  { %501 = vmatprep.subr.bf16.mxu1 %v648_v0  ;;  %517 = vmatprep.mubr.msk.bf16.mxu1 %vm649_vm0, %v648_v0  ;;  %v558_v6 = vld [vmem:[#allocation4 + $0x8] sm:$0xff]   ;;  %v552_v7 = vld [vmem:[#allocation2 + $0x20] sm:$0xff]   ;;  %v559_v8 = vld [vmem:[#allocation4 + $0x10] sm:$0xff]  }
  0x38   :  { %482 = vmatpush3.bf16.msra.mxu0 %v548_v1  ;;  %502 = vmatpush3.bf16.msra.mxu1 %v557_v4  ;;  %v553_v9 = vld [vmem:[#allocation2 + $0x28] sm:$0xff]   ;;  %v560_v10 = vld [vmem:[#allocation4 + $0x18] sm:$0xff]   ;;  %v554_v11 = vld [vmem:[#allocation2 + $0x30] sm:$0xff]  }
  0x39   :  { %483 = vmatprep.subr.bf16.mxu0 %v648_v0  ;;  %503 = vmatprep.subr.bf16.mxu1 %v648_v0  ;;  %v561_v12 = vld [vmem:[#allocation4 + $0x20] sm:$0xff]   ;;  %v555_v13 = vld [vmem:[#allocation2 + $0x38] sm:$0xff]   ;;  %v562_v14 = vld [vmem:[#allocation4 + $0x28] sm:$0xff]  }
  0x3a   :  { %v556_v15 = vld [vmem:[%s790_s0] sm:$0xff]   ;;  %v563_v16 = vld [vmem:[#allocation4 + $0x30] sm:$0xff]   ;;  %v564_v17 = vld [vmem:[#allocation4 + $0x38] sm:$0xff]  }
  0x3b   :  { %v565_v18 = vld [vmem:[#allocation6] sm:$0xff]   ;;  %v566_v19 = vld [vmem:[#allocation6 + $0x8] sm:$0xff]   ;;  %v567_v20 = vld [vmem:[#allocation6 + $0x10] sm:$0xff]  }
  0x3c   :  { %484 = vmatpush3.bf16.msra.mxu0 %v549_v2  ;;  %504 = vmatpush3.bf16.msra.mxu1 %v558_v6  ;;  %v568_v21 = vld [vmem:[#allocation6 + $0x18] sm:$0xff]   ;;  %v569_v22 = vld [vmem:[#allocation6 + $0x20] sm:$0xff]   ;;  %v570_v23 = vld [vmem:[#allocation6 + $0x28] sm:$0xff]  }
  0x3d   :  { %485 = vmatprep.subr.bf16.mxu0 %v648_v0  ;;  %505 = vmatprep.subr.bf16.mxu1 %v648_v0  ;;  %v426_v24 = vld [vmem:[%s792_s2] ss:$0 sm:$0xff]  ;;  %v571_v34 = vld [vmem:[#allocation6 + $0x30] sm:$0xff]   ;;  %v572_v35 = vld [vmem:[#allocation6 + $0x38] sm:$0xff]  }
  0x3e   :  { %v436_v36 = vld [vmem:[%s794_s4] ss:$0 sm:$0xff] }
  0x3f   :  { %v445_v46 = vld [vmem:[%s796_s6] ss:$0 sm:$0xff] }
  0x40   :  { %486 = vmatpush3.bf16.msra.mxu0 %v550_v3  ;;  %506 = vmatpush3.bf16.msra.mxu1 %v559_v8 }
  0x41   :  { %487 = vmatprep.subr.bf16.mxu0 %v648_v0  ;;  %507 = vmatprep.subr.bf16.mxu1 %v648_v0 }
  0x44   :  { %488 = vmatpush3.bf16.msra.mxu0 %v551_v5  ;;  %508 = vmatpush3.bf16.msra.mxu1 %v560_v10 }
  0x45   :  { %489 = vmatprep.subr.bf16.mxu0 %v648_v0  ;;  %509 = vmatprep.subr.bf16.mxu1 %v648_v0 }
  0x48   :  { %490 = vmatpush3.bf16.msra.mxu0 %v552_v7  ;;  %510 = vmatpush3.bf16.msra.mxu1 %v561_v12 }
  0x49   :  { %491 = vmatprep.subr.bf16.mxu0 %v648_v0  ;;  %511 = vmatprep.subr.bf16.mxu1 %v648_v0 }
  0x4c   :  { %492 = vmatpush3.bf16.msra.mxu0 %v553_v9  ;;  %512 = vmatpush3.bf16.msra.mxu1 %v562_v14 }
  0x4d   :  { %493 = vmatprep.subr.bf16.mxu0 %v648_v0  ;;  %513 = vmatprep.subr.bf16.mxu1 %v648_v0 }
  0x50   :  { %494 = vmatpush3.bf16.msra.mxu0 %v554_v11  ;;  %514 = vmatpush3.bf16.msra.mxu1 %v563_v16 }
  0x51   :  { %495 = vmatprep.subr.bf16.mxu0 %v648_v0  ;;  %515 = vmatprep.subr.bf16.mxu1 %v648_v0 }
  0x54   :  { %496 = vmatpush3.bf16.msra.mxu0 %v555_v13  ;;  %516 = vmatpush3.bf16.msra.mxu1 %v564_v17 }
  0x55   :  { %521 = vmatprep.subr.bf16.mxu0 %v648_v0 }
  0x57   :  { %498 = vmatmul.mubr.bf16.vlgmr.msra.gmra.mrb[0].mxu0 %v556_v15 }
  0x58   :  { %537 = vmatprep.mubr.msk.bf16.mxu0 %vm649_vm0, %v648_v0  ;;  %522 = vmatpush3.bf16.msra.mxu0 %v565_v18 }
  0x59   :  { %523 = vmatprep.subr.bf16.mxu0 %v648_v0 }
  0x5c   :  { %524 = vmatpush3.bf16.msra.mxu0 %v566_v19 }
  0x5d   :  { %525 = vmatprep.subr.bf16.mxu0 %v648_v0 }
  0x60   :  { %526 = vmatpush3.bf16.msra.mxu0 %v567_v20 }
  0x61   :  { %527 = vmatprep.subr.bf16.mxu0 %v648_v0 }
  0x64   :  { %528 = vmatpush3.bf16.msra.mxu0 %v568_v21 }
  0x65   :  { %529 = vmatprep.subr.bf16.mxu0 %v648_v0 }
  0x68   :  { %530 = vmatpush3.bf16.msra.mxu0 %v569_v22 }
  0x69   :  { %531 = vmatprep.subr.bf16.mxu0 %v648_v0 }
  0x6c   :  { %532 = vmatpush3.bf16.msra.mxu0 %v570_v23 }
  0x6d   :  { %533 = vmatprep.subr.bf16.mxu0 %v648_v0 }
  0x70   :  { %534 = vmatpush3.bf16.msra.mxu0 %v571_v34 }
  0x71   :  { %535 = vmatprep.subr.bf16.mxu0 %v648_v0 }
  0x74   :  { %536 = vmatpush3.bf16.msra.mxu0 %v572_v35 }
 0x12a   :  { %v181_v25 = vpop.f32.mrb[0].mxu0 }
 0x12b   :  { %v182_v26 = vadd.f32 %v426_v24, %v181_v25  ;;  %v499_v27 = vpop.f32.mrb[1].mxu0 }
 0x12c   :  { %v184_v28 = vpop.f32.mrb[2].mxu0 }
 0x12d   :  { %v185_v29 = vadd.f32 %v426_v24, %v184_v28  ;;  %v500_v30 = vpop.f32.mrb[3].mxu0  ;;  %v188_v31 = vmax.f32 %v182_v26, 0.0 }
 0x12f   :  { %v189_v32 = vmax.f32 %v185_v29, 0.0 }
 0x131   :  { %v190_v33 = vpack.c.bf16 %v189_v32, %v188_v31 }
 0x133   :  { %518 = vmatmul.mubr.bf16.vlgmr.msra.gmra.mrb[0].mxu1 %v190_v33 }
 0x206   :  { %v296_v37 = vpop.f32.mrb[0].mxu1 }
 0x207   :  { %v297_v38 = vadd.f32 %v436_v36, %v296_v37  ;;  %v519_v39 = vpop.f32.mrb[1].mxu1 }
 0x208   :  { %v299_v40 = vpop.f32.mrb[2].mxu1 }
 0x209   :  { %v300_v41 = vadd.f32 %v436_v36, %v299_v40  ;;  %v520_v42 = vpop.f32.mrb[3].mxu1  ;;  %v303_v43 = vmax.f32 %v297_v38, 0.0 }
 0x20b   :  { %v304_v44 = vmax.f32 %v300_v41, 0.0 }
 0x20d   :  { %v305_v45 = vpack.c.bf16 %v304_v44, %v303_v43 }
 0x20f   :  { %538 = vmatmul.mubr.bf16.vlgmr.msra.gmra.mrb[4].mxu0 %v305_v45 }
 0x2e2   :  { %v411_v47 = vpop.f32.mrb[4].mxu0 }
 0x2e3   :  { %v412_v48 = vadd.f32 %v445_v46, %v411_v47  ;;  %v539_v49 = vpop.f32.mrb[5].mxu0 }
 0x2e4   :  { %v414_v50 = vpop.f32.mrb[6].mxu0 }
 0x2e5   :  { %418 = vst [vmem:[%s797_s7] sm:$0xff] %v412_v48  ;;  %v415_v51 = vadd.f32 %v445_v46, %v414_v50  ;;  %v540_v52 = vpop.f32.mrb[7].mxu0 }
 0x2e7   :  { %419 = vst [vmem:[%s797_s7 + $0x8] sm:$0xff] %v415_v51 }
 0x2e8   :  { %424 = vsyncpa [#allocation3], 1 }
 0x2e9   :  { %425 = vsyncpa [#allocation5], 1 }

</bundles_post_ra>
